<compile_context>
chip_gen: v6e
topology: v6e:2x2x1
jax: 0.10.0
libtpu: 0.0.40
codegen_flags: <defaults>
</compile_context>

<pallas_src>
import jax
import jax.numpy as jnp
from jax import lax
from jax.experimental import pallas as pl
from jax.experimental.pallas import tpu as pltpu

M_MOMENTUM = 0.999          # moco momentum m
T_MOCO = 0.07               # softmax temperature
EPS = 1e-12                 # F.normalize default eps
_VMEM_LIMIT = 48 * 1024 * 1024   # explicit scoped-VMEM limit; safe on v5e/v6e/v7x


def _l2_normalize_rows(x):
    # F.normalize(x, dim=1) = x / max(||x||, eps) == x * rsqrt(max(||x||^2, eps^2))
    ss = jnp.sum(x * x, axis=1, keepdims=True)
    return x * lax.rsqrt(jnp.maximum(ss, EPS * EPS))


# ----------------------------------------------------------------------------
# Kernel 1: fused  momentum-EMA update  +  query encoder  +  key encoder  +  l_pos
# ----------------------------------------------------------------------------
def _encoder_ema_kernel(
    im_q_ref, im_k_ref,
    w1q_ref, b1q_ref, w2q_ref, b2q_ref,
    w1k_ref, b1k_ref, w2k_ref, b2k_ref,
    feats_q_ref, logits_q_ref, q_ref, k_ref, logits_k_ref, l_pos_ref,
    nw1k_ref, nb1k_ref, nw2k_ref, nb2k_ref,
):
    inv_hw = 1.0 / float(im_q_ref.shape[2])
    inv_t = 1.0 / T_MOCO
    one_minus_m = 1.0 - M_MOMENTUM

    # ---- momentum update of key-encoder params (f32 on the VPU) ----
    w1k = w1k_ref[...] * M_MOMENTUM + w1q_ref[...] * one_minus_m
    b1k = b1k_ref[...] * M_MOMENTUM + b1q_ref[...] * one_minus_m
    w2k = w2k_ref[...] * M_MOMENTUM + w2q_ref[...] * one_minus_m
    b2k = b2k_ref[...] * M_MOMENTUM + b2q_ref[...] * one_minus_m
    nw1k_ref[...] = w1k
    nb1k_ref[...] = b1k
    nw2k_ref[...] = w2k
    nb2k_ref[...] = b2k

    # ---- query encoder: lane-dense GAP over H*W, then two back-to-back MXU dots ----
    pooled_q = jnp.sum(im_q_ref[...], axis=2) * inv_hw                       # (B, C)
    feats_q = jnp.dot(pooled_q, w1q_ref[...],
                      preferred_element_type=jnp.float32) + b1q_ref[...]     # (B, D)
    logits_q = jnp.dot(feats_q, w2q_ref[...],
                       preferred_element_type=jnp.float32) + b2q_ref[...]    # (B, Cls)
    q = _l2_normalize_rows(feats_q)

    # ---- key encoder with the freshly EMA-updated params ----
    pooled_k = jnp.sum(im_k_ref[...], axis=2) * inv_hw
    feats_k = jnp.dot(pooled_k, w1k, preferred_element_type=jnp.float32) + b1k
    logits_k = jnp.dot(feats_k, w2k, preferred_element_type=jnp.float32) + b2k
    k = _l2_normalize_rows(feats_k)

    feats_q_ref[...] = feats_q
    logits_q_ref[...] = logits_q
    q_ref[...] = q
    k_ref[...] = k
    logits_k_ref[...] = logits_k
    # l_pos = einsum('nc,nc->n', q, k)[:, None] / T  (already temperature-scaled)
    l_pos_ref[...] = jnp.sum(q * k, axis=1, keepdims=True) * inv_t


# ----------------------------------------------------------------------------
# Kernel 2: l_neg = (q @ mem_feat) / T, tiled over K (parallel across cores)
# ----------------------------------------------------------------------------
def _l_neg_kernel(q_ref, mem_ref, out_ref):
    out_ref[...] = jnp.dot(q_ref[...], mem_ref[...],
                           preferred_element_type=jnp.float32) * (1.0 / T_MOCO)


# ----------------------------------------------------------------------------
# Kernel 3: l_neg_near = mem_feat.T @ mem_feat, tiled (K/ti, K/tj)
#   LHS is pre-transposed wrapper-side to (K, D) so the contraction is on the
#   minor axis (no XLU transpose inside the kernel).
# ----------------------------------------------------------------------------
def _l_neg_near_kernel(memt_ref, mem_ref, out_ref):
    out_ref[...] = jnp.dot(memt_ref[...], mem_ref[...],
                           preferred_element_type=jnp.float32)


def _pick_tile(n, cap):
    """Largest power-of-two-ish tile <= cap that divides n; else the full extent."""
    t = min(cap, n)
    while t >= 128:
        if n % t == 0:
            return t
        t //= 2
    return n


# ----------------------------------------------------------------------------
# Python wrapper (mirrors hwc_AdaMoCo.forward with cls_only=False,
# use_proto_loss_v2=None)
# ----------------------------------------------------------------------------
def hwc_adamoco_forward(im_q, im_k, params_q, params_k, mem_feat):
    B, C, H, W = im_q.shape
    D = params_q["w1"].shape[1]
    CLS = params_q["w2"].shape[1]
    K = mem_feat.shape[1]
    f32 = jnp.float32
    vm = pl.BlockSpec(memory_space=pltpu.MemorySpace.VMEM)

    # Lane-dense layout for the GAP: (B, C, H*W) -> one clean cross-lane reduce.
    imq = im_q.reshape(B, C, H * W)
    imk = im_k.reshape(B, C, H * W)

    # TODO(synk): _batch_shuffle_ddp / _batch_unshuffle_ddp / concat_all_gather are
    # DDP-only collectives; on a single device they reduce to identity permutations,
    # so im_k is fed to the key encoder directly.

    enc_out_shapes = (
        jax.ShapeDtypeStruct((B, D), f32),           # feats_q
        jax.ShapeDtypeStruct((B, CLS), f32),         # logits_q
        jax.ShapeDtypeStruct((B, D), f32),           # q (normalized)
        jax.ShapeDtypeStruct((B, D), f32),           # k (normalized)
        jax.ShapeDtypeStruct((B, CLS), f32),         # logits_k
        jax.ShapeDtypeStruct((B, 1), f32),           # l_pos / T
        jax.ShapeDtypeStruct(params_k["w1"].shape, f32),   # updated key params
        jax.ShapeDtypeStruct(params_k["b1"].shape, f32),
        jax.ShapeDtypeStruct(params_k["w2"].shape, f32),
        jax.ShapeDtypeStruct(params_k["b2"].shape, f32),
    )

    (feats_q, logits_q, q, k, logits_k, l_pos,
     nw1k, nb1k, nw2k, nb2k) = pl.pallas_call(
        _encoder_ema_kernel,
        out_shape=enc_out_shapes,
        in_specs=[vm] * 10,
        out_specs=tuple([vm] * 10),
        # Update key-encoder params in place (inputs 6..9 alias outputs 6..9).
        input_output_aliases={6: 6, 7: 7, 8: 8, 9: 9},
        compiler_params=pltpu.CompilerParams(vmem_limit_bytes=_VMEM_LIMIT),
    )(imq, imk,
      params_q["w1"], params_q["b1"], params_q["w2"], params_q["b2"],
      params_k["w1"], params_k["b1"], params_k["w2"], params_k["b2"])

    new_params_k = {"w1": nw1k, "b1": nb1k, "w2": nw2k, "b2": nb2k}

    # ---- l_neg = (q @ mem_feat) / T, tiled over K ----
    tkn = _pick_tile(K, 2048)
    l_neg = pl.pallas_call(
        _l_neg_kernel,
        out_shape=jax.ShapeDtypeStruct((B, K), f32),
        grid=(K // tkn,),
        in_specs=[
            pl.BlockSpec((B, D), lambda j: (0, 0)),
            pl.BlockSpec((D, tkn), lambda j: (0, j)),
        ],
        out_specs=pl.BlockSpec((B, tkn), lambda j: (0, j)),
        compiler_params=pltpu.CompilerParams(
            dimension_semantics=("parallel",),
            vmem_limit_bytes=_VMEM_LIMIT),
    )(q, mem_feat)

    # logits_ins = cat([l_pos, l_neg], dim=1) / T  (both pieces already scaled)
    logits_ins = jnp.concatenate([l_pos, l_neg], axis=1)

    # ---- l_neg_near = mem_feat.T @ mem_feat (image-independent; own tiled kernel so
    #      callers can hoist/cache it whenever mem_feat has not changed) ----
    ti = _pick_tile(K, 512)
    tj = _pick_tile(K, 512)
    mem_t = mem_feat.T  # (K, D): contraction on the minor axis of the LHS tile
    l_neg_near = pl.pallas_call(
        _l_neg_near_kernel,
        out_shape=jax.ShapeDtypeStruct((K, K), f32),
        grid=(K // ti, K // tj),
        in_specs=[
            pl.BlockSpec((ti, D), lambda i, j: (i, 0)),
            pl.BlockSpec((D, tj), lambda i, j: (0, j)),
        ],
        out_specs=pl.BlockSpec((ti, tj), lambda i, j: (i, j)),
        compiler_params=pltpu.CompilerParams(
            dimension_semantics=("parallel", "parallel"),
            vmem_limit_bytes=_VMEM_LIMIT),
    )(mem_t, mem_feat)

    # TODO(synk): use_proto_loss_v2 branch (proto cross-entropy) is not exercised; the
    # default (None) path returns loss_proto = None, matching the reference.
    loss_proto = None
    return feats_q, logits_q, logits_ins, k, logits_k, l_neg_near, loss_proto, new_params_k


# ----------------------------------------------------------------------------
# Main
# ----------------------------------------------------------------------------
if __name__ == "__main__":
    # Small shapes consistent with the module's forward
    B, C, H, W = 2, 4, 16, 16      # im_q / im_k: NCHW
    D = 32                         # src_model.output_dim (feature dim)
    CLS = 8                        # src_model.num_classes
    K = 128                        # memory bank size

    key = jax.random.PRNGKey(0)
    ks = jax.random.split(key, 12)

    im_q = jax.random.normal(ks[0], (B, C, H, W), jnp.float32)
    im_k = jax.random.normal(ks[1], (B, C, H, W), jnp.float32)

    # query (src_model) params -- deterministic synthetic init
    params_q = {
        "w1": jax.random.normal(ks[2], (C, D), jnp.float32) * 0.1,
        "b1": jax.random.normal(ks[3], (1, D), jnp.float32) * 0.01,
        "w2": jax.random.normal(ks[4], (D, CLS), jnp.float32) * 0.1,
        "b2": jax.random.normal(ks[5], (1, CLS), jnp.float32) * 0.01,
    }
    # key (momentum_model) params
    params_k = {
        "w1": jax.random.normal(ks[6], (C, D), jnp.float32) * 0.1,
        "b1": jax.random.normal(ks[7], (1, D), jnp.float32) * 0.01,
        "w2": jax.random.normal(ks[8], (D, CLS), jnp.float32) * 0.1,
        "b2": jax.random.normal(ks[9], (1, CLS), jnp.float32) * 0.01,
    }

    # register_buffer('mem_feat', torch.randn(D, K)); F.normalize(mem_feat, dim=0)
    mem_feat = jax.random.normal(ks[10], (D, K), jnp.float32)
    mem_feat = mem_feat / jnp.maximum(
        jnp.sqrt(jnp.sum(mem_feat * mem_feat, axis=0, keepdims=True)), EPS)

    (feats_q, logits_q, logits_ins, k_out, logits_k,
     l_neg_near, loss_proto, new_params_k) = hwc_adamoco_forward(
        im_q, im_k, params_q, params_k, mem_feat)

    jax.block_until_ready(
        (feats_q, logits_q, logits_ins, k_out, logits_k, l_neg_near,
         new_params_k["w1"], new_params_k["b1"],
         new_params_k["w2"], new_params_k["b2"]))

    assert feats_q.shape == (B, D)
    assert logits_q.shape == (B, CLS)
    assert logits_ins.shape == (B, 1 + K)
    assert k_out.shape == (B, D)
    assert logits_k.shape == (B, CLS)
    assert l_neg_near.shape == (K, K)
    assert new_params_k["w1"].shape == (C, D)
    assert loss_proto is None
    assert bool(jnp.isfinite(logits_ins).all())
    assert bool(jnp.isfinite(l_neg_near).all())

    print("KERNEL_OK")
</pallas_src>

<mosaic_0001>
module attributes {stable_mosaic.version = 11 : i64} {
  func.func @_encoder_ema_kernel(%arg0: memref<2x4x256xf32, #tpu.memory_space<vmem>>, %arg1: memref<2x4x256xf32, #tpu.memory_space<vmem>>, %arg2: memref<4x32xf32, #tpu.memory_space<vmem>>, %arg3: memref<1x32xf32, #tpu.memory_space<vmem>>, %arg4: memref<32x8xf32, #tpu.memory_space<vmem>>, %arg5: memref<1x8xf32, #tpu.memory_space<vmem>>, %arg6: memref<4x32xf32, #tpu.memory_space<vmem>>, %arg7: memref<1x32xf32, #tpu.memory_space<vmem>>, %arg8: memref<32x8xf32, #tpu.memory_space<vmem>>, %arg9: memref<1x8xf32, #tpu.memory_space<vmem>>, %arg10: memref<2x32xf32, #tpu.memory_space<vmem>>, %arg11: memref<2x8xf32, #tpu.memory_space<vmem>>, %arg12: memref<2x32xf32, #tpu.memory_space<vmem>>, %arg13: memref<2x32xf32, #tpu.memory_space<vmem>>, %arg14: memref<2x8xf32, #tpu.memory_space<vmem>>, %arg15: memref<2x1xf32, #tpu.memory_space<vmem>>, %arg16: memref<4x32xf32, #tpu.memory_space<vmem>>, %arg17: memref<1x32xf32, #tpu.memory_space<vmem>>, %arg18: memref<32x8xf32, #tpu.memory_space<vmem>>, %arg19: memref<1x8xf32, #tpu.memory_space<vmem>>) attributes {dimension_semantics = [], scalar_prefetch = 0 : i64, scratch_operands = 0 : i64, tpu.core_type = #tpu.core_type<tc>} {
    %c0 = arith.constant 0 : index
    %c0_0 = arith.constant 0 : index
    %0 = vector.load %arg6[%c0, %c0_0] : memref<4x32xf32, #tpu.memory_space<vmem>>, vector<4x32xf32>
    %cst = arith.constant 9.990000e-01 : f32
    %1 = vector.broadcast %cst : f32 to vector<4x32xf32>
    %2 = arith.mulf %0, %1 : vector<4x32xf32>
    %c0_1 = arith.constant 0 : index
    %c0_2 = arith.constant 0 : index
    %3 = vector.load %arg2[%c0_1, %c0_2] : memref<4x32xf32, #tpu.memory_space<vmem>>, vector<4x32xf32>
    %cst_3 = arith.constant 1.000000e-03 : f32
    %4 = vector.broadcast %cst_3 : f32 to vector<4x32xf32>
    %5 = arith.mulf %3, %4 : vector<4x32xf32>
    %6 = arith.addf %2, %5 : vector<4x32xf32>
    %c0_4 = arith.constant 0 : index
    %c0_5 = arith.constant 0 : index
    %7 = vector.load %arg7[%c0_4, %c0_5] : memref<1x32xf32, #tpu.memory_space<vmem>>, vector<1x32xf32>
    %cst_6 = arith.constant 9.990000e-01 : f32
    %8 = vector.broadcast %cst_6 : f32 to vector<1x32xf32>
    %9 = arith.mulf %7, %8 : vector<1x32xf32>
    %c0_7 = arith.constant 0 : index
    %c0_8 = arith.constant 0 : index
    %10 = vector.load %arg3[%c0_7, %c0_8] : memref<1x32xf32, #tpu.memory_space<vmem>>, vector<1x32xf32>
    %cst_9 = arith.constant 1.000000e-03 : f32
    %11 = vector.broadcast %cst_9 : f32 to vector<1x32xf32>
    %12 = arith.mulf %10, %11 : vector<1x32xf32>
    %13 = arith.addf %9, %12 : vector<1x32xf32>
    %c0_10 = arith.constant 0 : index
    %c0_11 = arith.constant 0 : index
    %14 = vector.load %arg8[%c0_10, %c0_11] : memref<32x8xf32, #tpu.memory_space<vmem>>, vector<32x8xf32>
    %cst_12 = arith.constant 9.990000e-01 : f32
    %15 = vector.broadcast %cst_12 : f32 to vector<32x8xf32>
    %16 = arith.mulf %14, %15 : vector<32x8xf32>
    %c0_13 = arith.constant 0 : index
    %c0_14 = arith.constant 0 : index
    %17 = vector.load %arg4[%c0_13, %c0_14] : memref<32x8xf32, #tpu.memory_space<vmem>>, vector<32x8xf32>
    %cst_15 = arith.constant 1.000000e-03 : f32
    %18 = vector.broadcast %cst_15 : f32 to vector<32x8xf32>
    %19 = arith.mulf %17, %18 : vector<32x8xf32>
    %20 = arith.addf %16, %19 : vector<32x8xf32>
    %c0_16 = arith.constant 0 : index
    %c0_17 = arith.constant 0 : index
    %21 = vector.load %arg9[%c0_16, %c0_17] : memref<1x8xf32, #tpu.memory_space<vmem>>, vector<1x8xf32>
    %cst_18 = arith.constant 9.990000e-01 : f32
    %22 = vector.broadcast %cst_18 : f32 to vector<1x8xf32>
    %23 = arith.mulf %21, %22 : vector<1x8xf32>
    %c0_19 = arith.constant 0 : index
    %c0_20 = arith.constant 0 : index
    %24 = vector.load %arg5[%c0_19, %c0_20] : memref<1x8xf32, #tpu.memory_space<vmem>>, vector<1x8xf32>
    %cst_21 = arith.constant 1.000000e-03 : f32
    %25 = vector.broadcast %cst_21 : f32 to vector<1x8xf32>
    %26 = arith.mulf %24, %25 : vector<1x8xf32>
    %27 = arith.addf %23, %26 : vector<1x8xf32>
    %c0_22 = arith.constant 0 : index
    %c0_23 = arith.constant 0 : index
    %28 = vector.load %arg16[%c0_22, %c0_23] : memref<4x32xf32, #tpu.memory_space<vmem>>, vector<4x32xf32>
    tpu.vector_store %arg16[%c0_22, %c0_23], %6 {strides = array<i32>} : memref<4x32xf32, #tpu.memory_space<vmem>>, vector<4x32xf32>,
    %c0_24 = arith.constant 0 : index
    %c0_25 = arith.constant 0 : index
    %29 = vector.load %arg17[%c0_24, %c0_25] : memref<1x32xf32, #tpu.memory_space<vmem>>, vector<1x32xf32>
    tpu.vector_store %arg17[%c0_24, %c0_25], %13 {strides = array<i32>} : memref<1x32xf32, #tpu.memory_space<vmem>>, vector<1x32xf32>,
    %c0_26 = arith.constant 0 : index
    %c0_27 = arith.constant 0 : index
    %30 = vector.load %arg18[%c0_26, %c0_27] : memref<32x8xf32, #tpu.memory_space<vmem>>, vector<32x8xf32>
    tpu.vector_store %arg18[%c0_26, %c0_27], %20 {strides = array<i32>} : memref<32x8xf32, #tpu.memory_space<vmem>>, vector<32x8xf32>,
    %c0_28 = arith.constant 0 : index
    %c0_29 = arith.constant 0 : index
    %31 = vector.load %arg19[%c0_28, %c0_29] : memref<1x8xf32, #tpu.memory_space<vmem>>, vector<1x8xf32>
    tpu.vector_store %arg19[%c0_28, %c0_29], %27 {strides = array<i32>} : memref<1x8xf32, #tpu.memory_space<vmem>>, vector<1x8xf32>,
    %c0_30 = arith.constant 0 : index
    %c0_31 = arith.constant 0 : index
    %c0_32 = arith.constant 0 : index
    %32 = vector.load %arg0[%c0_30, %c0_31, %c0_32] : memref<2x4x256xf32, #tpu.memory_space<vmem>>, vector<2x4x256xf32>
    %cst_33 = arith.constant dense<0.000000e+00> : vector<2x4xf32>
    %33 = vector.multi_reduction <add>, %32, %cst_33 [2] : vector<2x4x256xf32> to vector<2x4xf32>
    %cst_34 = arith.constant 3.906250e-03 : f32
    %34 = vector.broadcast %cst_34 : f32 to vector<2x4xf32>
    %35 = arith.mulf %33, %34 : vector<2x4xf32>
    %c0_35 = arith.constant 0 : index
    %c0_36 = arith.constant 0 : index
    %36 = vector.load %arg2[%c0_35, %c0_36] : memref<4x32xf32, #tpu.memory_space<vmem>>, vector<4x32xf32>
    %cst_37 = arith.constant dense<0.000000e+00> : vector<2x32xf32>
    %37 = tpu.matmul %35, %36, %cst_37 {dimension_numbers = #tpu.dot_dimension_numbers<[1], [0], [0], [1], [0, 0, 1, 1], [], []>} : vector<2x4xf32>, vector<4x32xf32>, vector<2x32xf32> -> vector<2x32xf32>
    %c0_38 = arith.constant 0 : index
    %c0_39 = arith.constant 0 : index
    %38 = vector.load %arg3[%c0_38, %c0_39] : memref<1x32xf32, #tpu.memory_space<vmem>>, vector<1x32xf32>
    %39 = vector.broadcast %38 : vector<1x32xf32> to vector<2x32xf32>
    %40 = arith.addf %37, %39 : vector<2x32xf32>
    %c0_40 = arith.constant 0 : index
    %c0_41 = arith.constant 0 : index
    %41 = vector.load %arg4[%c0_40, %c0_41] : memref<32x8xf32, #tpu.memory_space<vmem>>, vector<32x8xf32>
    %cst_42 = arith.constant dense<0.000000e+00> : vector<2x8xf32>
    %42 = tpu.matmul %40, %41, %cst_42 {dimension_numbers = #tpu.dot_dimension_numbers<[1], [0], [0], [1], [0, 0, 1, 1], [], []>} : vector<2x32xf32>, vector<32x8xf32>, vector<2x8xf32> -> vector<2x8xf32>
    %c0_43 = arith.constant 0 : index
    %c0_44 = arith.constant 0 : index
    %43 = vector.load %arg5[%c0_43, %c0_44] : memref<1x8xf32, #tpu.memory_space<vmem>>, vector<1x8xf32>
    %44 = vector.broadcast %43 : vector<1x8xf32> to vector<2x8xf32>
    %45 = arith.addf %42, %44 : vector<2x8xf32>
    %46 = arith.mulf %40, %40 : vector<2x32xf32>
    %cst_45 = arith.constant dense<0.000000e+00> : vector<2xf32>
    %47 = vector.multi_reduction <add>, %46, %cst_45 [1] : vector<2x32xf32> to vector<2xf32>
    %48 = vector.shape_cast %47 : vector<2xf32> to vector<2x1xf32>
    %cst_46 = arith.constant 1.000000e-24 : f32
    %49 = vector.broadcast %cst_46 : f32 to vector<2x1xf32>
    %50 = arith.maximumf %48, %49 : vector<2x1xf32>
    %51 = math.rsqrt %50 : vector<2x1xf32>
    %52 = vector.broadcast %51 : vector<2x1xf32> to vector<2x32xf32>
    %53 = arith.mulf %40, %52 : vector<2x32xf32>
    %c0_47 = arith.constant 0 : index
    %c0_48 = arith.constant 0 : index
    %c0_49 = arith.constant 0 : index
    %54 = vector.load %arg1[%c0_47, %c0_48, %c0_49] : memref<2x4x256xf32, #tpu.memory_space<vmem>>, vector<2x4x256xf32>
    %cst_50 = arith.constant dense<0.000000e+00> : vector<2x4xf32>
    %55 = vector.multi_reduction <add>, %54, %cst_50 [2] : vector<2x4x256xf32> to vector<2x4xf32>
    %cst_51 = arith.constant 3.906250e-03 : f32
    %56 = vector.broadcast %cst_51 : f32 to vector<2x4xf32>
    %57 = arith.mulf %55, %56 : vector<2x4xf32>
    %cst_52 = arith.constant dense<0.000000e+00> : vector<2x32xf32>
    %58 = tpu.matmul %57, %6, %cst_52 {dimension_numbers = #tpu.dot_dimension_numbers<[1], [0], [0], [1], [0, 0, 1, 1], [], []>} : vector<2x4xf32>, vector<4x32xf32>, vector<2x32xf32> -> vector<2x32xf32>
    %59 = vector.broadcast %13 : vector<1x32xf32> to vector<2x32xf32>
    %60 = arith.addf %58, %59 : vector<2x32xf32>
    %cst_53 = arith.constant dense<0.000000e+00> : vector<2x8xf32>
    %61 = tpu.matmul %60, %20, %cst_53 {dimension_numbers = #tpu.dot_dimension_numbers<[1], [0], [0], [1], [0, 0, 1, 1], [], []>} : vector<2x32xf32>, vector<32x8xf32>, vector<2x8xf32> -> vector<2x8xf32>
    %62 = vector.broadcast %27 : vector<1x8xf32> to vector<2x8xf32>
    %63 = arith.addf %61, %62 : vector<2x8xf32>
    %64 = arith.mulf %60, %60 : vector<2x32xf32>
    %cst_54 = arith.constant dense<0.000000e+00> : vector<2xf32>
    %65 = vector.multi_reduction <add>, %64, %cst_54 [1] : vector<2x32xf32> to vector<2xf32>
    %66 = vector.shape_cast %65 : vector<2xf32> to vector<2x1xf32>
    %cst_55 = arith.constant 1.000000e-24 : f32
    %67 = vector.broadcast %cst_55 : f32 to vector<2x1xf32>
    %68 = arith.maximumf %66, %67 : vector<2x1xf32>
    %69 = math.rsqrt %68 : vector<2x1xf32>
    %70 = vector.broadcast %69 : vector<2x1xf32> to vector<2x32xf32>
    %71 = arith.mulf %60, %70 : vector<2x32xf32>
    %c0_56 = arith.constant 0 : index
    %c0_57 = arith.constant 0 : index
    %72 = vector.load %arg10[%c0_56, %c0_57] : memref<2x32xf32, #tpu.memory_space<vmem>>, vector<2x32xf32>
    tpu.vector_store %arg10[%c0_56, %c0_57], %40 {strides = array<i32>} : memref<2x32xf32, #tpu.memory_space<vmem>>, vector<2x32xf32>,
    %c0_58 = arith.constant 0 : index
    %c0_59 = arith.constant 0 : index
    %73 = vector.load %arg11[%c0_58, %c0_59] : memref<2x8xf32, #tpu.memory_space<vmem>>, vector<2x8xf32>
    tpu.vector_store %arg11[%c0_58, %c0_59], %45 {strides = array<i32>} : memref<2x8xf32, #tpu.memory_space<vmem>>, vector<2x8xf32>,
    %c0_60 = arith.constant 0 : index
    %c0_61 = arith.constant 0 : index
    %74 = vector.load %arg12[%c0_60, %c0_61] : memref<2x32xf32, #tpu.memory_space<vmem>>, vector<2x32xf32>
    tpu.vector_store %arg12[%c0_60, %c0_61], %53 {strides = array<i32>} : memref<2x32xf32, #tpu.memory_space<vmem>>, vector<2x32xf32>,
    %c0_62 = arith.constant 0 : index
    %c0_63 = arith.constant 0 : index
    %75 = vector.load %arg13[%c0_62, %c0_63] : memref<2x32xf32, #tpu.memory_space<vmem>>, vector<2x32xf32>
    tpu.vector_store %arg13[%c0_62, %c0_63], %71 {strides = array<i32>} : memref<2x32xf32, #tpu.memory_space<vmem>>, vector<2x32xf32>,
    %c0_64 = arith.constant 0 : index
    %c0_65 = arith.constant 0 : index
    %76 = vector.load %arg14[%c0_64, %c0_65] : memref<2x8xf32, #tpu.memory_space<vmem>>, vector<2x8xf32>
    tpu.vector_store %arg14[%c0_64, %c0_65], %63 {strides = array<i32>} : memref<2x8xf32, #tpu.memory_space<vmem>>, vector<2x8xf32>,
    %77 = arith.mulf %53, %71 : vector<2x32xf32>
    %cst_66 = arith.constant dense<0.000000e+00> : vector<2xf32>
    %78 = vector.multi_reduction <add>, %77, %cst_66 [1] : vector<2x32xf32> to vector<2xf32>
    %79 = vector.shape_cast %78 : vector<2xf32> to vector<2x1xf32>
    %cst_67 = arith.constant 14.2857141 : f32
    %80 = vector.broadcast %cst_67 : f32 to vector<2x1xf32>
    %81 = arith.mulf %79, %80 : vector<2x1xf32>
    %c0_68 = arith.constant 0 : index
    %c0_69 = arith.constant 0 : index
    %82 = vector.load %arg15[%c0_68, %c0_69] : memref<2x1xf32, #tpu.memory_space<vmem>>, vector<2x1xf32>
    tpu.vector_store %arg15[%c0_68, %c0_69], %81 {strides = array<i32>} : memref<2x1xf32, #tpu.memory_space<vmem>>, vector<2x1xf32>,
    return
  }
}

</mosaic_0001>

<bundles_post_ra>
// kernel: tpu_custom_call.1
= control target key start
LH: loop header
LB: loop body
LE: loop exit
PB: predicated region body
PF: predicated region fallthrough
CT: control target
= control target key end

     0   :  { %s1035_s0 = inlined_call_operand.vmem [shape: f32[2,4,256], index: 0, kind: input, shape index: {}]   ;;  %s1036_s1 = inlined_call_operand.vmem [shape: f32[2,4,256], index: 1, kind: input, shape index: {}]   ;;  %s1037_s2 = inlined_call_operand.vmem [shape: f32[4,32], index: 2, kind: input, shape index: {}]   ;;  %s1038_s3 = inlined_call_operand.vmem [shape: f32[1,32], index: 3, kind: input, shape index: {}]   ;;  %s1039_s4 = inlined_call_operand.vmem [shape: f32[32,8], index: 4, kind: input, shape index: {}]   ;;  %s1040_s5 = inlined_call_operand.vmem [shape: f32[1,8], index: 5, kind: input, shape index: {}]   ;;  %s1041_s6 = inlined_call_operand.vmem [shape: f32[4,32], index: 6, kind: input, shape index: {}, may-alias: {6,16}]   ;;  %s1042_s7 = inlined_call_operand.vmem [shape: f32[1,32], index: 7, kind: input, shape index: {}, may-alias: {7,17}]   ;;  %s1043_s8 = inlined_call_operand.vmem [shape: f32[32,8], index: 8, kind: input, shape index: {}, may-alias: {8,18}]   ;;  %s1044_s9 = inlined_call_operand.vmem [shape: f32[1,8], index: 9, kind: input, shape index: {}, may-alias: {9,19}]   ;;  %s1045_s10 = inlined_call_operand.hbm [shape: f32[2,32], index: 10, kind: output, shape index: {0}]   ;;  %s1046_s11 = inlined_call_operand.hbm [shape: f32[2,8], index: 11, kind: output, shape index: {1}]   ;;  %s1047_s12 = inlined_call_operand.hbm [shape: f32[2,32], index: 12, kind: output, shape index: {2}]   ;;  %s1048_s13 = inlined_call_operand.hbm [shape: f32[2,32], index: 13, kind: output, shape index: {3}]   ;;  %s1049_s14 = inlined_call_operand.hbm [shape: f32[2,8], index: 14, kind: output, shape index: {4}]   ;;  %s1050_s15 = inlined_call_operand.vmem [shape: f32[2,1], index: 15, kind: output, shape index: {5}]   ;;  %s1051_s16 = inlined_call_operand.vmem [shape: f32[4,32], index: 16, kind: output, shape index: {6}, may-alias: {6,16}]   ;;  %s1052_s17 = inlined_call_operand.vmem [shape: f32[1,32], index: 17, kind: output, shape index: {7}, may-alias: {7,17}]   ;;  %s1053_s18 = inlined_call_operand.vmem [shape: f32[32,8], index: 18, kind: output, shape index: {8}, may-alias: {8,18}]   ;;  %s1054_s19 = inlined_call_operand.vmem [shape: f32[1,8], index: 19, kind: output, shape index: {9}, may-alias: {9,19}]  }
   0x1   :  { %1059 = sst [smem:[#allocation13_spill]] %s1035_s0 }
   0x2   :  { %1060 = sst [smem:[#allocation14_spill]] %s1036_s1 }
   0x3   :  { %1061 = sst [smem:[#allocation15_spill]] %s1037_s2 }
   0x4   :  { %1062 = sst [smem:[#allocation16_spill]] %s1038_s3 }
   0x5   :  { %25 = vsyncpa [#allocation3], 0 }
   0x6   :  { %26 = vsyncpa [#allocation5], 0  ;;  %vm102_vm0 = vcmask 1043456   ;;  %s1063_s20 = sld [smem:[#allocation14_spill]] }
   0x7   :  { %s1064_s22 = sld [smem:[#allocation13_spill]] }
   0xc   :  { %v306_v0 = vld [vmem:[%s1063_s20] sm:$0xff]  ;;  %v307_v2 = vld [vmem:[%s1063_s20 + $0x8] sm:$0xff] }
   0xd   :  { %v94_v1 = vld [vmem:[%s1064_s22] sm:$0xff]  ;;  %v310_v3 = vcombine.high %v306_v0, %v306_v0  ;;  %v314_v4 = vsel %vm102_vm0, %v306_v0, 0.0  ;;  %v95_v7 = vld [vmem:[%s1064_s22 + $0x8] sm:$0xff] }
   0xe   :  { %v98_v5 = vcombine.high %v94_v1, %v94_v1  ;;  %v103_v6 = vsel %vm102_vm0, %v94_v1, 0.0 }
   0xf   :  { %27 = vsyncpa [#allocation8], 0  ;;  %v311_v8 = vcombine.high %v307_v2, %v307_v2  ;;  %v99_v9 = vcombine.high %v95_v7, %v95_v7  ;;  %v315_v10 = vsel %vm102_vm0, %v310_v3, 0.0  ;;  %v319_v12 = vsel %vm102_vm0, %v307_v2, 0.0  ;;  %v48_v20 = vld [vmem:[%s1041_s6] sm:$0xf] }
  0x10   :  { %v104_v11 = vsel %vm102_vm0, %v98_v5, 0.0  ;;  %v108_v13 = vsel %vm102_vm0, %v95_v7, 0.0  ;;  %v316_v14 = vadd.f32 %v315_v10, %v314_v4  ;;  %s1065_s29 = sld [smem:[#allocation15_spill]]  ;;  %v49_v22 = vmul.f32 0.999, %v48_v20  ;;  %v216_v27 = vld [vmem:[%s1039_s4 + $0x18] sm:$0xff] }
  0x11   :  { %v105_v15 = vadd.f32 %v104_v11, %v103_v6  ;;  %v320_v16 = vsel %vm102_vm0, %v311_v8, 0.0  ;;  %v109_v17 = vsel %vm102_vm0, %v99_v9, 0.0  ;;  %vm83_vm1 = vcmask 257024   ;;  %v61_v28 = vld [vmem:[%s1043_s8 + $0x18] sm:$0xff]  ;;  %v215_v31 = vld [vmem:[%s1039_s4 + $0x10] sm:$0xff]  ;;  %s1066_s20 = sld [smem:[#allocation16_spill]] }
  0x12   :  { %317 = vadd.xlane.f32.xlu1 %v316_v14  ;;  %v321_v18 = vadd.f32 %v320_v16, %v319_v12  ;;  %v110_v19 = vadd.f32 %v109_v17, %v108_v13  ;;  %v780_v26 = vmov 0.0   ;;  %vm781_vm2 = vmmov 0   ;;  %v60_v32 = vld [vmem:[%s1043_s8 + $0x10] sm:$0xff]  ;;  %v53_v55 = vld [vmem:[%s1042_s7] sm:$0x1]  ;;  %v214_v57 = vld [vmem:[%s1039_s4 + $0x8] sm:$0xff] }
  0x13   :  { %106 = vadd.xlane.f32.xlu0 %v105_v15  ;;  %627 = vmatprep.subr.mxu1 %v780_v26  ;;  %v73_v29 = vmul.f32 0.001, %v216_v27  ;;  %v65_v30 = vmul.f32 0.999, %v61_v28  ;;  %vm87_vm3 = vcmask 64512   ;;  %v125_v37 = vlaneseq  ;;  %v213_v63 = vld [vmem:[%s1039_s4] sm:$0xff] }
  0x14   :  { %643 = vmatprep.subr.mxu0 %v780_v26  ;;  %629 = vmatprep.mubr.msk.f32.mxu1 %vm781_vm2, %v780_v26  ;;  %v72_v33 = vmul.f32 0.001, %v215_v31  ;;  %v64_v35 = vmul.f32 0.999, %v60_v32  ;;  %vm135_vm4 = vcmask 1041409   ;;  %vm137_vm5 = vcmask 31744  }
  0x15   :  { %645 = vmatprep.mubr.msk.f32.mxu0 %vm781_vm2, %v780_v26  ;;  %v77_v34 = vadd.f32 %v73_v29, %v65_v30  ;;  %v126_v38 = vand.u32 127, %v125_v37  ;;  %v949_v39 = vshrl.u32 %v125_v37, 7  ;;  %v54_v58 = vmul.f32 0.999, %v53_v55  ;;  %v80_v20 = vld [vmem:[%s1040_s5] sm:$0x1] }
  0x16   :  { %322 = vadd.xlane.f32.xlu1 %v321_v18  ;;  %v50_v21 = vld [vmem:[%s1065_s29] sm:$0xf]  ;;  %v76_v36 = vadd.f32 %v72_v33, %v64_v35  ;;  %v71_v62 = vmul.f32 0.001, %v214_v57  ;;  %v70_v3 = vmul.f32 0.001, %v213_v63 }
  0x17   :  { %111 = vadd.xlane.f32.xlu0 %v110_v19  ;;  %v51_v23 = vmul.f32 0.001, %v50_v21  ;;  %v115_v24 = vld [vmem:[%s1065_s29] sm:$0xf]  ;;  %91 = vst.msk [vmem:[%s1053_s18 + $0x18] sm:$0xff] %vm87_vm3, %v77_v34  ;;  %v129_v42 = vsub.s32 %v126_v38, %v949_v39  ;;  %vm85_vm6 = vcmask 253952  }
  0x18   :  { %628 = vmatpush3.msk.msra.mxu1 %vm102_vm0, %v115_v24  ;;  %90 = vst.msk [vmem:[%s1053_s18 + $0x10] sm:$0xff] %vm87_vm3, %v76_v36  ;;  %v55_v56 = vld [vmem:[%s1066_s20] sm:$0x1]  ;;  %v329_v6 = vsub.s32 0, %v949_v39  ;;  %vm224_vm7 = vcmask 261120   ;;  %vm299_vm8 = vcmask 254976  }
  0x19   :  { %v52_v25 = vadd.f32 %v51_v23, %v49_v22  ;;  %632 = vmatprep.subr.mxu1 %v780_v26  ;;  %v56_v60 = vmul.f32 0.001, %v55_v56  ;;  %v605_v8 = vld [vmem:[%s1066_s20] ss:$0 sm:$0xff]  ;;  %v81_v22 = vmul.f32 0.001, %v80_v20 }
  0x1a   :  { %v78_v19 = vld [vmem:[%s1044_s9] sm:$0x1]  ;;  %vm92_vm9 = vcmask 57344   ;;  %s782_s9 = smov [#allocation7]  }
  0x1b   :  { %84 = vst.msk [vmem:[%s1051_s16] sm:$0xf] %vm83_vm1, %v52_v25  ;;  %644 = vmatpush3.msk.msra.mxu0 %vm102_vm0, %v52_v25  ;;  %v57_v4 = vadd.f32 %v56_v60, %v54_v58  ;;  %v79_v21 = vmul.f32 0.999, %v78_v19 }
  0x1c   :  { %648 = vmatprep.subr.mxu0 %v780_v26 }
  0x1d   :  { %86 = vst.msk [vmem:[%s1052_s17] sm:$0x1] %vm85_vm6, %v57_v4  ;;  %v330_v7 = vrot.slane %v57_v4, %v329_v6  ;;  %v82_v23 = vadd.f32 %v81_v22, %v79_v21 }
  0x1f   :  { %v59_v59 = vld [vmem:[%s1043_s8 + $0x8] sm:$0xff]  ;;  %v58_v0 = vld [vmem:[%s1043_s8] sm:$0xff]  ;;  %93 = vst.msk [vmem:[%s1054_s19] sm:$0x1] %vm92_vm9, %v82_v23  ;;  %s553_s19 = sshll.u32 %s782_s9, 4  ;;  %s554_s19 = int_to_ptr.vmem [resolvable:$true] %s553_s19 }
  0x20   :  { %v63_v61 = vmul.f32 0.999, %v59_v59  ;;  %v62_v2 = vmul.f32 0.999, %v58_v0  ;;  %s674_s21 = scalar_lea.vmem %s554_s19, 32  ;;  %p679_p1 = scmp.lt.s32.totalorder %s554_s19, %s554_s19 }
  0x21   :  { %p675_p0 = scmp.ne.s32.totalorder %s554_s19, %s674_s21  ;;  %p680_p2 = scmp.lt.s32.totalorder %s674_s21, %s674_s21 }
  0x22   :  { %v75_v1 = vadd.f32 %v71_v62, %v63_v61  ;;  %v74_v5 = vadd.f32 %v70_v3, %v62_v2 }
  0x23   :  { %p681_p3 = por %p680_p2, %p679_p1 }
  0x24   :  { %89 = vst.msk [vmem:[%s1053_s18 + $0x8] sm:$0xff] %vm87_vm3, %v75_v1  ;;  %88 = vst.msk [vmem:[%s1053_s18] sm:$0xff] %vm87_vm3, %v74_v5 }
  0x25   :  { %p682_p4 = pnand %p681_p3, %p675_p0 }
  0x9b   :  { %v318_v40 = vpop.xlane.xlu1 %317 }
  0x9c   :  { %v107_v41 = vpop.xlane.xlu0 %106  ;;  %v324_v43 = vmul.f32 0.00390625, %v318_v40 }
  0x9d   :  { %v113_v44 = vmul.f32 0.00390625, %v107_v41 }
  0x9e   :  { %v337_v49 = vrot.slane %v324_v43, %v129_v42 }
  0x9f   :  { %v323_v45 = vpop.xlane.xlu1 %322  ;;  %v130_v50 = vrot.slane %v113_v44, %v129_v42 }
  0xa0   :  { %v112_v46 = vpop.xlane.xlu0 %111  ;;  %v325_v47 = vmul.f32 0.00390625, %v323_v45 }
  0xa1   :  { %v114_v48 = vmul.f32 0.00390625, %v112_v46 }
  0xa2   :  { %v341_v51 = vrot.slane %v325_v47, %v129_v42 }
  0xa3   :  { %v134_v52 = vrot.slane %v114_v48, %v129_v42 }
  0xa4   :  { %v342_v54 = vsel %vm135_vm4, %v341_v51, %v337_v49 }
  0xa5   :  { %v136_v53 = vsel %vm135_vm4, %v134_v52, %v130_v50  ;;  %646 = vmatmul.mubr.msk.f32.vlgmr.msra.gmra.mxu0 %vm137_vm5, %v342_v54 }
  0xa6   :  { %630 = vmatmul.mubr.msk.f32.vlgmr.msra.gmra.mxu1 %vm137_vm5, %v136_v53  ;;  %649 = vmatpush3.msra.mxu0 %v77_v34 }
  0xa7   :  { %633 = vmatpush3.msra.mxu1 %v216_v27  ;;  %650 = vmatprep.subr.mxu0 %v780_v26 }
  0xa8   :  { %634 = vmatprep.subr.mxu1 %v780_v26  ;;  %651 = vmatpush3.msra.mxu0 %v76_v36 }
  0xa9   :  { %635 = vmatpush3.msra.mxu1 %v215_v31  ;;  %652 = vmatprep.subr.mxu0 %v780_v26 }
  0xaa   :  { %636 = vmatprep.subr.mxu1 %v780_v26  ;;  %640 = vmatprep.mubr.msk.f32.mxu1 %vm781_vm2, %v780_v26 }
  0xab   :  { %656 = vmatprep.mubr.msk.f32.mxu0 %vm781_vm2, %v780_v26  ;;  %637 = vmatpush3.msra.mxu1 %v214_v57 }
  0xac   :  { %638 = vmatprep.subr.mxu1 %v780_v26  ;;  %653 = vmatpush3.msra.mxu0 %v75_v1 }
  0xad   :  { %639 = vmatpush3.msra.mxu1 %v213_v63  ;;  %654 = vmatprep.subr.mxu0 %v780_v26 }
  0xae   :  { %655 = vmatpush3.msra.mxu0 %v74_v5 }
 0x165   :  { %v414_v10 = vpop.f32.mrf.mxu0 }
 0x166   :  { %v209_v9 = vpop.f32.mrf.mxu1  ;;  %v415_v12 = vadd.f32 %v414_v10, %v330_v7 }
 0x167   :  { %v210_v11 = vadd.f32 %v605_v8, %v209_v9  ;;  %v647_v14 = vpop.f32.mrf.mxu0 }
 0x168   :  { %v631_v13 = vpop.f32.mrf.mxu1  ;;  %657 = vmatmul.mubr.msk.f32.vlgmr.msra.gmra.mxu0 %vm224_vm7, %v415_v12  ;;  %v497_v16 = vmul.f32 %v415_v12, %v415_v12 }
 0x169   :  { %641 = vmatmul.mubr.msk.f32.vlgmr.msra.gmra.mxu1 %vm224_vm7, %v210_v11  ;;  %v298_v15 = vmul.f32 %v210_v11, %v210_v11  ;;  %504 = vst.msk [vmem:[#allocation2] sm:$0x3] %vm299_vm8, %v210_v11 }
 0x16a   :  { %v498_v18 = vsel %vm299_vm8, %v497_v16, 0.0 }
 0x16b   :  { %v300_v17 = vsel %vm299_vm8, %v298_v15, 0.0  ;;  %499 = vadd.xlane.f32.xlu1 %v498_v18 }
 0x16c   :  { %301 = vadd.xlane.f32.xlu0 %v300_v17 }
 0x1f4   :  { %v500_v25 = vpop.xlane.xlu1 %499 }
 0x1f5   :  { %v302_v24 = vpop.xlane.xlu0 %301  ;;  %v501_v27 = vmax.f32 %v500_v25, 1e-24 }
 0x1f6   :  { %v303_v26 = vmax.f32 %v302_v24, 1e-24 }
 0x1f8   :  { %670 = vrsqrt.f32 %v303_v26 }
 0x1f9   :  { %672 = vrsqrt.f32 %v501_v27 }
 0x205   :  { %v671_v28 = vpop.eup %670 }
 0x206   :  { %v673_v29 = vpop.eup %672  ;;  %v305_v30 = vmul.f32 %v671_v28, %v210_v11 }
 0x207   :  { %v503_v31 = vmul.f32 %v673_v29, %v415_v12 }
 0x208   :  { %507 = vst.msk [vmem:[#allocation6] sm:$0x3] %vm299_vm8, %v305_v30 }
 0x209   :  { %v510_v32 = vmul.f32 %v503_v31, %v305_v30  ;;  %508 = vst.msk [vmem:[#allocation7] sm:$0x3] %vm299_vm8, %v503_v31 }
 0x20b   :  { %v511_v33 = vsel %vm299_vm8, %v510_v32, 0.0 }
 0x20c   :  { %512 = vadd.xlane.f32.xlu0 %v511_v33 }
 0x20d   :  { %685 = shalt.err (!%p682_p4)
}
 0x20e   :  { %556 = dma.vmem_to_hbm [thread:$0]  %s554_s19, 32, %s1048_s13, [#allocation8]  }
 0x20f   :  { %s783_s2 = smov [#allocation2]  }
 0x210   :  { %s523_s7 = sshll.u32 %s783_s2, 4  ;;  %s524_s7 = int_to_ptr.vmem [resolvable:$true] %s523_s7 }
 0x211   :  { %s694_s16 = scalar_lea.vmem %s524_s7, 32  ;;  %p699_p6 = scmp.lt.s32.totalorder %s524_s7, %s524_s7 }
 0x212   :  { %p695_p5 = scmp.ne.s32.totalorder %s524_s7, %s694_s16  ;;  %p700_p7 = scmp.lt.s32.totalorder %s694_s16, %s694_s16 }
 0x214   :  { %p701_p8 = por %p700_p7, %p699_p6 }
 0x216   :  { %p702_p9 = pnand %p701_p8, %p695_p5 }
 0x218   :  { %705 = shalt.err (!%p702_p9)
}
 0x219   :  { %526 = dma.vmem_to_hbm [thread:$0]  %s524_s7, 32, %s1045_s10, [#allocation3]   ;;  %v422_v34 = vrot.slane %v82_v23, %v329_v6  ;;  %v608_v35 = vld [vmem:[%s1040_s5] ss:$0 sm:$0xff]  ;;  %vm505_vm10 = vcmask 58368  }
 0x21a   :  { %s784_s13 = smov [#allocation4]   ;;  %s785_s26 = smov [#allocation6]  }
 0x21b   :  { %s533_s4 = sshll.u32 %s784_s13, 4  ;;  %s543_s8 = sshll.u32 %s785_s26, 4  ;;  %s534_s4 = int_to_ptr.vmem [resolvable:$true] %s533_s4  ;;  %s544_s8 = int_to_ptr.vmem [resolvable:$true] %s543_s8 }
 0x21c   :  { %s786_s27 = smov [#allocation9]   ;;  %s714_s10 = scalar_lea.vmem %s534_s4, 32 }
 0x21d   :  { %s563_s28 = sshll.u32 %s786_s27, 4  ;;  %p715_p10 = scmp.ne.s32.totalorder %s534_s4, %s714_s10  ;;  %s564_s28 = int_to_ptr.vmem [resolvable:$true] %s563_s28 }
 0x21e   :  { %p719_p11 = scmp.lt.s32.totalorder %s534_s4, %s534_s4  ;;  %p720_p12 = scmp.lt.s32.totalorder %s714_s10, %s714_s10 }
 0x220   :  { %p721_p13 = por %p720_p12, %p719_p11 }
 0x222   :  { %p722_p0 = pnand %p721_p13, %p715_p10 }
 0x228   :  { %v493_v37 = vpop.f32.mrf.mxu0 }
 0x229   :  { %v294_v36 = vpop.f32.mrf.mxu1  ;;  %v494_v40 = vadd.f32 %v493_v37, %v422_v34 }
 0x22a   :  { %v295_v38 = vadd.f32 %v608_v35, %v294_v36  ;;  %v658_v42 = vpop.f32.mrf.mxu0 }
 0x22b   :  { %v642_v41 = vpop.f32.mrf.mxu1  ;;  %509 = vst.msk [vmem:[#allocation9] sm:$0x3] %vm505_vm10, %v494_v40 }
 0x22c   :  { %506 = vst.msk [vmem:[#allocation4] sm:$0x3] %vm505_vm10, %v295_v38 }
 0x22d   :  { %725 = shalt.err (!%p722_p0)
}
 0x22e   :  { %536 = dma.vmem_to_hbm [thread:$0]  %s534_s4, 32, %s1046_s11, [#allocation5]  }
 0x22f   :  { %s734_s17 = scalar_lea.vmem %s544_s8, 32  ;;  %p739_p2 = scmp.lt.s32.totalorder %s544_s8, %s544_s8 }
 0x230   :  { %p735_p1 = scmp.ne.s32.totalorder %s544_s8, %s734_s17  ;;  %p740_p3 = scmp.lt.s32.totalorder %s734_s17, %s734_s17 }
 0x232   :  { %p741_p4 = por %p740_p3, %p739_p2 }
 0x234   :  { %p742_p5 = pnand %p741_p4, %p735_p1 }
 0x236   :  { %745 = shalt.err (!%p742_p5)
}
 0x237   :  { %546 = dma.vmem_to_hbm [thread:$0]  %s544_s8, 32, %s1047_s12, [#allocation5]  }
 0x238   :  { %s754_s30 = scalar_lea.vmem %s564_s28, 32  ;;  %p759_p7 = scmp.lt.s32.totalorder %s564_s28, %s564_s28 }
 0x239   :  { %p755_p6 = scmp.ne.s32.totalorder %s564_s28, %s754_s30  ;;  %p760_p8 = scmp.lt.s32.totalorder %s754_s30, %s754_s30 }
 0x23b   :  { %p761_p9 = por %p760_p8, %p759_p7 }
 0x23d   :  { %p762_p10 = pnand %p761_p9, %p755_p6 }
 0x23f   :  { %765 = shalt.err (!%p762_p10)
}
 0x240   :  { %566 = dma.vmem_to_hbm [thread:$0]  %s564_s28, 32, %s1049_s14, [#allocation8]   ;;  %vm515_vm11 = vcmask 1024  }
 0x295   :  { %v513_v39 = vpop.xlane.xlu0 %512 }
 0x296   :  { %v514_v43 = vmul.f32 14.285714, %v513_v39 }
 0x298   :  { %516 = vst.msk [vmem:[%s1050_s15] sm:$0x3] %vm515_vm11, %v514_v43 }
 0x299   :  { %774 = dma.done.wait [#allocation3], 32  }
 0x29a   :  { %775 = vsyncadd [#allocation3], 4294967264 }
 0x29b   :  { %776 = dma.done.wait [#allocation5], 64  }
 0x29c   :  { %777 = vsyncadd [#allocation5], 4294967232 }
 0x29d   :  { %778 = dma.done.wait [#allocation8], 64  }
 0x29e   :  { %779 = vsyncadd [#allocation8], 4294967232 }
 0x29f   :  { %602 = vsyncpa [#allocation3], 1 }
 0x2a0   :  { %603 = vsyncpa [#allocation5], 1 }
 0x2a1   :  { %604 = vsyncpa [#allocation8], 1 }

</bundles_post_ra>
